<compile_context>
chip_gen: v7x
topology: tpu7x:2x2x1
jax: 0.10.0
libtpu: 0.0.40
codegen_flags: <defaults>
</compile_context>

<pallas_src>
import jax
import jax.numpy as jnp
from jax.experimental import pallas as pl
from jax.experimental.pallas import tpu as pltpu

IN_DIM = 4
HID_DIM = 10
OUT_DIM = 2
LANE = 128
MAX_TILE = 2048  # lanes per grid step (multiple of 128); tiny VMEM footprint


def _round_up(n, m):
    return ((n + m - 1) // m) * m


def policy_net_kernel(x_ref, w1t_ref, b1_ref, w2t_ref, b2_ref, out_ref):
    # x_ref   : [IN_DIM,  TB]   (batch on lanes)
    # w1t_ref : [HID_DIM, IN_DIM]
    # b1_ref  : [HID_DIM, 1]
    # w2t_ref : [OUT_DIM, HID_DIM]
    # b2_ref  : [OUT_DIM, 1]
    # out_ref : [2*OUT_DIM, TB]  rows 0:2 policy probs, rows 2:4 value logits
    x = x_ref[...]
    w1t = w1t_ref[...]
    b1 = b1_ref[...]
    w2t = w2t_ref[...]
    b2 = b2_ref[...]
    tb = x.shape[-1]

    # ---- Layer 1 (shared by both heads): h = W1^T @ x + b1 as unrolled
    #      VPU outer-product FMAs (K=4).
    h = jnp.broadcast_to(b1, (HID_DIM, tb))
    for k in range(IN_DIM):
        h = h + w1t[:, k:k + 1] * x[k:k + 1, :]          # [10,1]*[1,TB] -> [10,TB]

    h_relu = jnp.maximum(h, 0.0)

    # ---- Layer 2, both heads in one unrolled loop (K=10, no MXU round-trips).
    pol_logits = jnp.broadcast_to(b2, (OUT_DIM, tb))
    value = jnp.broadcast_to(b2, (OUT_DIM, tb))
    for k in range(HID_DIM):
        wcol = w2t[:, k:k + 1]                           # [2,1]
        pol_logits = pol_logits + wcol * h_relu[k:k + 1, :]
        value = value + wcol * h[k:k + 1, :]             # value head: no ReLU (matches spec)

    # ---- 2-class softmax == sigmoid of the logit difference (exact, overflow-safe).
    d = pol_logits[0:1, :] - pol_logits[1:2, :]          # [1, TB]
    p0 = 1.0 / (1.0 + jnp.exp(-d))
    p1 = 1.0 / (1.0 + jnp.exp(d))

    out_ref[...] = jnp.concatenate([p0, p1, value], axis=0).astype(out_ref.dtype)


def policy_network_forward(x, w1, b1, w2, b2):
    """x: [B, 4]; w1: [4, 10]; b1: [10]; w2: [10, 2]; b2: [2].

    Returns (policy [B, 2], value [B, 2]) matching the PyTorch forward.
    """
    B = x.shape[0]
    x = x.astype(jnp.float32)

    # Lane-dense layout: batch on lanes, padded to a multiple of the tile size.
    B_pad = _round_up(B, LANE)
    TB = B_pad if B_pad <= MAX_TILE else MAX_TILE
    B_pad = _round_up(B_pad, TB)
    grid = (B_pad // TB,)

    x_t = jnp.zeros((IN_DIM, B_pad), jnp.float32).at[:, :B].set(x.T)
    w1t = w1.T.astype(jnp.float32)                        # [10, 4]
    b1c = b1.reshape(HID_DIM, 1).astype(jnp.float32)      # [10, 1]
    w2t = w2.T.astype(jnp.float32)                        # [2, 10]
    b2c = b2.reshape(OUT_DIM, 1).astype(jnp.float32)      # [2, 1]

    out = pl.pallas_call(
        policy_net_kernel,
        out_shape=jax.ShapeDtypeStruct((2 * OUT_DIM, B_pad), jnp.float32),
        grid=grid,
        in_specs=[
            pl.BlockSpec((IN_DIM, TB), lambda i: (0, i)),          # x tile
            pl.BlockSpec((HID_DIM, IN_DIM), lambda i: (0, 0)),     # W1^T (VMEM-resident)
            pl.BlockSpec((HID_DIM, 1), lambda i: (0, 0)),          # b1   (VMEM-resident)
            pl.BlockSpec((OUT_DIM, HID_DIM), lambda i: (0, 0)),    # W2^T (VMEM-resident)
            pl.BlockSpec((OUT_DIM, 1), lambda i: (0, 0)),          # b2   (VMEM-resident)
        ],
        out_specs=pl.BlockSpec((2 * OUT_DIM, TB), lambda i: (0, i)),
        compiler_params=pltpu.CompilerParams(
            dimension_semantics=("parallel",)),
    )(x_t, w1t, b1c, w2t, b2c)

    policy = out[0:OUT_DIM, :B].T                         # [B, 2]
    value = out[OUT_DIM:2 * OUT_DIM, :B].T                # [B, 2]
    return policy, value


def init_params(key):
    # PyTorch nn.Linear default init: U(-1/sqrt(fan_in), 1/sqrt(fan_in)).
    # Stored as [in, out] (i.e. transposed vs torch's [out, in]).
    k1, k2, k3, k4 = jax.random.split(key, 4)
    bound1 = 1.0 / jnp.sqrt(IN_DIM)
    bound2 = 1.0 / jnp.sqrt(HID_DIM)
    w1 = jax.random.uniform(k1, (IN_DIM, HID_DIM), jnp.float32, -bound1, bound1)
    b1 = jax.random.uniform(k2, (HID_DIM,), jnp.float32, -bound1, bound1)
    w2 = jax.random.uniform(k3, (HID_DIM, OUT_DIM), jnp.float32, -bound2, bound2)
    b2 = jax.random.uniform(k4, (OUT_DIM,), jnp.float32, -bound2, bound2)
    return w1, b1, w2, b2


def _reference(x, w1, b1, w2, b2):
    h = x @ w1 + b1
    policy = jax.nn.softmax(jnp.maximum(h, 0.0) @ w2 + b2, axis=-1)
    value = h @ w2 + b2
    return policy, value


if __name__ == "__main__":
    key = jax.random.PRNGKey(0)
    kx, kp, kx2 = jax.random.split(key, 3)
    w1, b1, w2, b2 = init_params(kp)

    # Small single-tile case (B=8 -> padded to one 128-lane tile).
    B = 8
    x = jax.random.normal(kx, (B, IN_DIM), jnp.float32)
    policy, value = policy_network_forward(x, w1, b1, w2, b2)
    jax.block_until_ready((policy, value))
    ref_policy, ref_value = _reference(x, w1, b1, w2, b2)
    assert jnp.allclose(policy, ref_policy, atol=1e-5, rtol=1e-5)
    assert jnp.allclose(value, ref_value, atol=1e-5, rtol=1e-5)

    # Non-multiple-of-128 batch to exercise the padding + tiling path.
    B2 = 300
    x2 = jax.random.normal(kx2, (B2, IN_DIM), jnp.float32)
    policy2, value2 = policy_network_forward(x2, w1, b1, w2, b2)
    jax.block_until_ready((policy2, value2))
    ref_policy2, ref_value2 = _reference(x2, w1, b1, w2, b2)
    assert jnp.allclose(policy2, ref_policy2, atol=1e-5, rtol=1e-5)
    assert jnp.allclose(value2, ref_value2, atol=1e-5, rtol=1e-5)

    print("KERNEL_OK")
</pallas_src>

<mosaic_0001>
module attributes {stable_mosaic.version = 11 : i64} {
  func.func @policy_net_kernel(%arg0: i32, %arg1: memref<4x128xf32, #tpu.memory_space<vmem>>, %arg2: memref<10x4xf32, #tpu.memory_space<vmem>>, %arg3: memref<10x1xf32, #tpu.memory_space<vmem>>, %arg4: memref<2x10xf32, #tpu.memory_space<vmem>>, %arg5: memref<2x1xf32, #tpu.memory_space<vmem>>, %arg6: memref<4x128xf32, #tpu.memory_space<vmem>>) attributes {dimension_semantics = [#tpu.dimension_semantics<parallel>], iteration_bounds = array<i64: 1>, scalar_prefetch = 0 : i64, scratch_operands = 0 : i64, tpu.core_type = #tpu.core_type<tc>, window_params = [{transform_indices = @transform_0, window_bounds = array<i64: 4, 128>}, {pipeline_mode = #tpu.pipeline_mode<synchronous>, transform_indices = @transform_1, window_bounds = array<i64: 10, 4>}, {pipeline_mode = #tpu.pipeline_mode<synchronous>, transform_indices = @transform_2, window_bounds = array<i64: 10, 1>}, {pipeline_mode = #tpu.pipeline_mode<synchronous>, transform_indices = @transform_3, window_bounds = array<i64: 2, 10>}, {pipeline_mode = #tpu.pipeline_mode<synchronous>, transform_indices = @transform_4, window_bounds = array<i64: 2, 1>}, {transform_indices = @transform_5, window_bounds = array<i64: 4, 128>}]} {
    %c0 = arith.constant 0 : index
    %c0_0 = arith.constant 0 : index
    %0 = vector.load %arg1[%c0, %c0_0] : memref<4x128xf32, #tpu.memory_space<vmem>>, vector<4x128xf32>
    %c0_1 = arith.constant 0 : index
    %c0_2 = arith.constant 0 : index
    %1 = vector.load %arg2[%c0_1, %c0_2] : memref<10x4xf32, #tpu.memory_space<vmem>>, vector<10x4xf32>
    %c0_3 = arith.constant 0 : index
    %c0_4 = arith.constant 0 : index
    %2 = vector.load %arg3[%c0_3, %c0_4] : memref<10x1xf32, #tpu.memory_space<vmem>>, vector<10x1xf32>
    %c0_5 = arith.constant 0 : index
    %c0_6 = arith.constant 0 : index
    %3 = vector.load %arg4[%c0_5, %c0_6] : memref<2x10xf32, #tpu.memory_space<vmem>>, vector<2x10xf32>
    %c0_7 = arith.constant 0 : index
    %c0_8 = arith.constant 0 : index
    %4 = vector.load %arg5[%c0_7, %c0_8] : memref<2x1xf32, #tpu.memory_space<vmem>>, vector<2x1xf32>
    %5 = vector.shape_cast %2 : vector<10x1xf32> to vector<10x1xf32>
    %6 = vector.broadcast %5 : vector<10x1xf32> to vector<10x128xf32>
    %7 = vector.extract_strided_slice %1 {offsets = [0, 0], sizes = [10, 1], strides = [1, 1]} : vector<10x4xf32> to vector<10x1xf32>
    %8 = vector.extract_strided_slice %0 {offsets = [0, 0], sizes = [1, 128], strides = [1, 1]} : vector<4x128xf32> to vector<1x128xf32>
    %9 = vector.broadcast %7 : vector<10x1xf32> to vector<10x128xf32>
    %10 = vector.broadcast %8 : vector<1x128xf32> to vector<10x128xf32>
    %11 = arith.mulf %9, %10 : vector<10x128xf32>
    %12 = arith.addf %6, %11 : vector<10x128xf32>
    %13 = vector.extract_strided_slice %1 {offsets = [0, 1], sizes = [10, 1], strides = [1, 1]} : vector<10x4xf32> to vector<10x1xf32>
    %14 = vector.extract_strided_slice %0 {offsets = [1, 0], sizes = [1, 128], strides = [1, 1]} : vector<4x128xf32> to vector<1x128xf32>
    %15 = vector.broadcast %13 : vector<10x1xf32> to vector<10x128xf32>
    %16 = vector.broadcast %14 : vector<1x128xf32> to vector<10x128xf32>
    %17 = arith.mulf %15, %16 : vector<10x128xf32>
    %18 = arith.addf %12, %17 : vector<10x128xf32>
    %19 = vector.extract_strided_slice %1 {offsets = [0, 2], sizes = [10, 1], strides = [1, 1]} : vector<10x4xf32> to vector<10x1xf32>
    %20 = vector.extract_strided_slice %0 {offsets = [2, 0], sizes = [1, 128], strides = [1, 1]} : vector<4x128xf32> to vector<1x128xf32>
    %21 = vector.broadcast %19 : vector<10x1xf32> to vector<10x128xf32>
    %22 = vector.broadcast %20 : vector<1x128xf32> to vector<10x128xf32>
    %23 = arith.mulf %21, %22 : vector<10x128xf32>
    %24 = arith.addf %18, %23 : vector<10x128xf32>
    %25 = vector.extract_strided_slice %1 {offsets = [0, 3], sizes = [10, 1], strides = [1, 1]} : vector<10x4xf32> to vector<10x1xf32>
    %26 = vector.extract_strided_slice %0 {offsets = [3, 0], sizes = [1, 128], strides = [1, 1]} : vector<4x128xf32> to vector<1x128xf32>
    %27 = vector.broadcast %25 : vector<10x1xf32> to vector<10x128xf32>
    %28 = vector.broadcast %26 : vector<1x128xf32> to vector<10x128xf32>
    %29 = arith.mulf %27, %28 : vector<10x128xf32>
    %30 = arith.addf %24, %29 : vector<10x128xf32>
    %cst = arith.constant 0.000000e+00 : f32
    %31 = vector.broadcast %cst : f32 to vector<10x128xf32>
    %32 = arith.maximumf %30, %31 : vector<10x128xf32>
    %33 = vector.shape_cast %4 : vector<2x1xf32> to vector<2x1xf32>
    %34 = vector.broadcast %33 : vector<2x1xf32> to vector<2x128xf32>
    %35 = vector.shape_cast %4 : vector<2x1xf32> to vector<2x1xf32>
    %36 = vector.broadcast %35 : vector<2x1xf32> to vector<2x128xf32>
    %37 = vector.extract_strided_slice %3 {offsets = [0, 0], sizes = [2, 1], strides = [1, 1]} : vector<2x10xf32> to vector<2x1xf32>
    %38 = vector.extract_strided_slice %32 {offsets = [0, 0], sizes = [1, 128], strides = [1, 1]} : vector<10x128xf32> to vector<1x128xf32>
    %39 = vector.broadcast %37 : vector<2x1xf32> to vector<2x128xf32>
    %40 = vector.broadcast %38 : vector<1x128xf32> to vector<2x128xf32>
    %41 = arith.mulf %39, %40 : vector<2x128xf32>
    %42 = arith.addf %34, %41 : vector<2x128xf32>
    %43 = vector.extract_strided_slice %30 {offsets = [0, 0], sizes = [1, 128], strides = [1, 1]} : vector<10x128xf32> to vector<1x128xf32>
    %44 = vector.broadcast %37 : vector<2x1xf32> to vector<2x128xf32>
    %45 = vector.broadcast %43 : vector<1x128xf32> to vector<2x128xf32>
    %46 = arith.mulf %44, %45 : vector<2x128xf32>
    %47 = arith.addf %36, %46 : vector<2x128xf32>
    %48 = vector.extract_strided_slice %3 {offsets = [0, 1], sizes = [2, 1], strides = [1, 1]} : vector<2x10xf32> to vector<2x1xf32>
    %49 = vector.extract_strided_slice %32 {offsets = [1, 0], sizes = [1, 128], strides = [1, 1]} : vector<10x128xf32> to vector<1x128xf32>
    %50 = vector.broadcast %48 : vector<2x1xf32> to vector<2x128xf32>
    %51 = vector.broadcast %49 : vector<1x128xf32> to vector<2x128xf32>
    %52 = arith.mulf %50, %51 : vector<2x128xf32>
    %53 = arith.addf %42, %52 : vector<2x128xf32>
    %54 = vector.extract_strided_slice %30 {offsets = [1, 0], sizes = [1, 128], strides = [1, 1]} : vector<10x128xf32> to vector<1x128xf32>
    %55 = vector.broadcast %48 : vector<2x1xf32> to vector<2x128xf32>
    %56 = vector.broadcast %54 : vector<1x128xf32> to vector<2x128xf32>
    %57 = arith.mulf %55, %56 : vector<2x128xf32>
    %58 = arith.addf %47, %57 : vector<2x128xf32>
    %59 = vector.extract_strided_slice %3 {offsets = [0, 2], sizes = [2, 1], strides = [1, 1]} : vector<2x10xf32> to vector<2x1xf32>
    %60 = vector.extract_strided_slice %32 {offsets = [2, 0], sizes = [1, 128], strides = [1, 1]} : vector<10x128xf32> to vector<1x128xf32>
    %61 = vector.broadcast %59 : vector<2x1xf32> to vector<2x128xf32>
    %62 = vector.broadcast %60 : vector<1x128xf32> to vector<2x128xf32>
    %63 = arith.mulf %61, %62 : vector<2x128xf32>
    %64 = arith.addf %53, %63 : vector<2x128xf32>
    %65 = vector.extract_strided_slice %30 {offsets = [2, 0], sizes = [1, 128], strides = [1, 1]} : vector<10x128xf32> to vector<1x128xf32>
    %66 = vector.broadcast %59 : vector<2x1xf32> to vector<2x128xf32>
    %67 = vector.broadcast %65 : vector<1x128xf32> to vector<2x128xf32>
    %68 = arith.mulf %66, %67 : vector<2x128xf32>
    %69 = arith.addf %58, %68 : vector<2x128xf32>
    %70 = vector.extract_strided_slice %3 {offsets = [0, 3], sizes = [2, 1], strides = [1, 1]} : vector<2x10xf32> to vector<2x1xf32>
    %71 = vector.extract_strided_slice %32 {offsets = [3, 0], sizes = [1, 128], strides = [1, 1]} : vector<10x128xf32> to vector<1x128xf32>
    %72 = vector.broadcast %70 : vector<2x1xf32> to vector<2x128xf32>
    %73 = vector.broadcast %71 : vector<1x128xf32> to vector<2x128xf32>
    %74 = arith.mulf %72, %73 : vector<2x128xf32>
    %75 = arith.addf %64, %74 : vector<2x128xf32>
    %76 = vector.extract_strided_slice %30 {offsets = [3, 0], sizes = [1, 128], strides = [1, 1]} : vector<10x128xf32> to vector<1x128xf32>
    %77 = vector.broadcast %70 : vector<2x1xf32> to vector<2x128xf32>
    %78 = vector.broadcast %76 : vector<1x128xf32> to vector<2x128xf32>
    %79 = arith.mulf %77, %78 : vector<2x128xf32>
    %80 = arith.addf %69, %79 : vector<2x128xf32>
    %81 = vector.extract_strided_slice %3 {offsets = [0, 4], sizes = [2, 1], strides = [1, 1]} : vector<2x10xf32> to vector<2x1xf32>
    %82 = vector.extract_strided_slice %32 {offsets = [4, 0], sizes = [1, 128], strides = [1, 1]} : vector<10x128xf32> to vector<1x128xf32>
    %83 = vector.broadcast %81 : vector<2x1xf32> to vector<2x128xf32>
    %84 = vector.broadcast %82 : vector<1x128xf32> to vector<2x128xf32>
    %85 = arith.mulf %83, %84 : vector<2x128xf32>
    %86 = arith.addf %75, %85 : vector<2x128xf32>
    %87 = vector.extract_strided_slice %30 {offsets = [4, 0], sizes = [1, 128], strides = [1, 1]} : vector<10x128xf32> to vector<1x128xf32>
    %88 = vector.broadcast %81 : vector<2x1xf32> to vector<2x128xf32>
    %89 = vector.broadcast %87 : vector<1x128xf32> to vector<2x128xf32>
    %90 = arith.mulf %88, %89 : vector<2x128xf32>
    %91 = arith.addf %80, %90 : vector<2x128xf32>
    %92 = vector.extract_strided_slice %3 {offsets = [0, 5], sizes = [2, 1], strides = [1, 1]} : vector<2x10xf32> to vector<2x1xf32>
    %93 = vector.extract_strided_slice %32 {offsets = [5, 0], sizes = [1, 128], strides = [1, 1]} : vector<10x128xf32> to vector<1x128xf32>
    %94 = vector.broadcast %92 : vector<2x1xf32> to vector<2x128xf32>
    %95 = vector.broadcast %93 : vector<1x128xf32> to vector<2x128xf32>
    %96 = arith.mulf %94, %95 : vector<2x128xf32>
    %97 = arith.addf %86, %96 : vector<2x128xf32>
    %98 = vector.extract_strided_slice %30 {offsets = [5, 0], sizes = [1, 128], strides = [1, 1]} : vector<10x128xf32> to vector<1x128xf32>
    %99 = vector.broadcast %92 : vector<2x1xf32> to vector<2x128xf32>
    %100 = vector.broadcast %98 : vector<1x128xf32> to vector<2x128xf32>
    %101 = arith.mulf %99, %100 : vector<2x128xf32>
    %102 = arith.addf %91, %101 : vector<2x128xf32>
    %103 = vector.extract_strided_slice %3 {offsets = [0, 6], sizes = [2, 1], strides = [1, 1]} : vector<2x10xf32> to vector<2x1xf32>
    %104 = vector.extract_strided_slice %32 {offsets = [6, 0], sizes = [1, 128], strides = [1, 1]} : vector<10x128xf32> to vector<1x128xf32>
    %105 = vector.broadcast %103 : vector<2x1xf32> to vector<2x128xf32>
    %106 = vector.broadcast %104 : vector<1x128xf32> to vector<2x128xf32>
    %107 = arith.mulf %105, %106 : vector<2x128xf32>
    %108 = arith.addf %97, %107 : vector<2x128xf32>
    %109 = vector.extract_strided_slice %30 {offsets = [6, 0], sizes = [1, 128], strides = [1, 1]} : vector<10x128xf32> to vector<1x128xf32>
    %110 = vector.broadcast %103 : vector<2x1xf32> to vector<2x128xf32>
    %111 = vector.broadcast %109 : vector<1x128xf32> to vector<2x128xf32>
    %112 = arith.mulf %110, %111 : vector<2x128xf32>
    %113 = arith.addf %102, %112 : vector<2x128xf32>
    %114 = vector.extract_strided_slice %3 {offsets = [0, 7], sizes = [2, 1], strides = [1, 1]} : vector<2x10xf32> to vector<2x1xf32>
    %115 = vector.extract_strided_slice %32 {offsets = [7, 0], sizes = [1, 128], strides = [1, 1]} : vector<10x128xf32> to vector<1x128xf32>
    %116 = vector.broadcast %114 : vector<2x1xf32> to vector<2x128xf32>
    %117 = vector.broadcast %115 : vector<1x128xf32> to vector<2x128xf32>
    %118 = arith.mulf %116, %117 : vector<2x128xf32>
    %119 = arith.addf %108, %118 : vector<2x128xf32>
    %120 = vector.extract_strided_slice %30 {offsets = [7, 0], sizes = [1, 128], strides = [1, 1]} : vector<10x128xf32> to vector<1x128xf32>
    %121 = vector.broadcast %114 : vector<2x1xf32> to vector<2x128xf32>
    %122 = vector.broadcast %120 : vector<1x128xf32> to vector<2x128xf32>
    %123 = arith.mulf %121, %122 : vector<2x128xf32>
    %124 = arith.addf %113, %123 : vector<2x128xf32>
    %125 = vector.extract_strided_slice %3 {offsets = [0, 8], sizes = [2, 1], strides = [1, 1]} : vector<2x10xf32> to vector<2x1xf32>
    %126 = vector.extract_strided_slice %32 {offsets = [8, 0], sizes = [1, 128], strides = [1, 1]} : vector<10x128xf32> to vector<1x128xf32>
    %127 = vector.broadcast %125 : vector<2x1xf32> to vector<2x128xf32>
    %128 = vector.broadcast %126 : vector<1x128xf32> to vector<2x128xf32>
    %129 = arith.mulf %127, %128 : vector<2x128xf32>
    %130 = arith.addf %119, %129 : vector<2x128xf32>
    %131 = vector.extract_strided_slice %30 {offsets = [8, 0], sizes = [1, 128], strides = [1, 1]} : vector<10x128xf32> to vector<1x128xf32>
    %132 = vector.broadcast %125 : vector<2x1xf32> to vector<2x128xf32>
    %133 = vector.broadcast %131 : vector<1x128xf32> to vector<2x128xf32>
    %134 = arith.mulf %132, %133 : vector<2x128xf32>
    %135 = arith.addf %124, %134 : vector<2x128xf32>
    %136 = vector.extract_strided_slice %3 {offsets = [0, 9], sizes = [2, 1], strides = [1, 1]} : vector<2x10xf32> to vector<2x1xf32>
    %137 = vector.extract_strided_slice %32 {offsets = [9, 0], sizes = [1, 128], strides = [1, 1]} : vector<10x128xf32> to vector<1x128xf32>
    %138 = vector.broadcast %136 : vector<2x1xf32> to vector<2x128xf32>
    %139 = vector.broadcast %137 : vector<1x128xf32> to vector<2x128xf32>
    %140 = arith.mulf %138, %139 : vector<2x128xf32>
    %141 = arith.addf %130, %140 : vector<2x128xf32>
    %142 = vector.extract_strided_slice %30 {offsets = [9, 0], sizes = [1, 128], strides = [1, 1]} : vector<10x128xf32> to vector<1x128xf32>
    %143 = vector.broadcast %136 : vector<2x1xf32> to vector<2x128xf32>
    %144 = vector.broadcast %142 : vector<1x128xf32> to vector<2x128xf32>
    %145 = arith.mulf %143, %144 : vector<2x128xf32>
    %146 = arith.addf %135, %145 : vector<2x128xf32>
    %147 = vector.extract_strided_slice %141 {offsets = [0, 0], sizes = [1, 128], strides = [1, 1]} : vector<2x128xf32> to vector<1x128xf32>
    %148 = vector.extract_strided_slice %141 {offsets = [1, 0], sizes = [1, 128], strides = [1, 1]} : vector<2x128xf32> to vector<1x128xf32>
    %149 = arith.subf %147, %148 : vector<1x128xf32>
    %cst_9 = arith.constant 0.000000e+00 : f32
    %150 = vector.broadcast %cst_9 : f32 to vector<1x128xf32>
    %151 = arith.subf %150, %149 : vector<1x128xf32>
    %152 = math.exp %151 : vector<1x128xf32>
    %cst_10 = arith.constant 1.000000e+00 : f32
    %153 = vector.broadcast %cst_10 : f32 to vector<1x128xf32>
    %154 = arith.addf %153, %152 : vector<1x128xf32>
    %cst_11 = arith.constant 1.000000e+00 : f32
    %155 = vector.broadcast %cst_11 : f32 to vector<1x128xf32>
    %156 = arith.divf %155, %154 : vector<1x128xf32>
    %157 = math.exp %149 : vector<1x128xf32>
    %cst_12 = arith.constant 1.000000e+00 : f32
    %158 = vector.broadcast %cst_12 : f32 to vector<1x128xf32>
    %159 = arith.addf %158, %157 : vector<1x128xf32>
    %cst_13 = arith.constant 1.000000e+00 : f32
    %160 = vector.broadcast %cst_13 : f32 to vector<1x128xf32>
    %161 = arith.divf %160, %159 : vector<1x128xf32>
    %162 = tpu.concatenate %156, %161, %146 in 0 : vector<1x128xf32>, vector<1x128xf32>, vector<2x128xf32> -> vector<4x128xf32>
    %c0_14 = arith.constant 0 : index
    %c0_15 = arith.constant 0 : index
    %163 = vector.load %arg6[%c0_14, %c0_15] : memref<4x128xf32, #tpu.memory_space<vmem>>, vector<4x128xf32>
    tpu.vector_store %arg6[%c0_14, %c0_15], %162 {strides = array<i32>} : memref<4x128xf32, #tpu.memory_space<vmem>>, vector<4x128xf32>,
    return
  }
  func.func @transform_0(%arg0: i32) -> (i32, i32) {
    %c0_i32 = arith.constant 0 : i32
    %c0_i32_0 = arith.constant 0 : i32
    return %c0_i32, %arg0 : i32, i32
  }
  func.func @transform_1(%arg0: i32) -> (i32, i32) {
    %c0_i32 = arith.constant 0 : i32
    %c0_i32_0 = arith.constant 0 : i32
    %c0_i32_1 = arith.constant 0 : i32
    return %c0_i32, %c0_i32_0 : i32, i32
  }
  func.func @transform_2(%arg0: i32) -> (i32, i32) {
    %c0_i32 = arith.constant 0 : i32
    %c0_i32_0 = arith.constant 0 : i32
    %c0_i32_1 = arith.constant 0 : i32
    return %c0_i32, %c0_i32_0 : i32, i32
  }
  func.func @transform_3(%arg0: i32) -> (i32, i32) {
    %c0_i32 = arith.constant 0 : i32
    %c0_i32_0 = arith.constant 0 : i32
    %c0_i32_1 = arith.constant 0 : i32
    return %c0_i32, %c0_i32_0 : i32, i32
  }
  func.func @transform_4(%arg0: i32) -> (i32, i32) {
    %c0_i32 = arith.constant 0 : i32
    %c0_i32_0 = arith.constant 0 : i32
    %c0_i32_1 = arith.constant 0 : i32
    return %c0_i32, %c0_i32_0 : i32, i32
  }
  func.func @transform_5(%arg0: i32) -> (i32, i32) {
    %c0_i32 = arith.constant 0 : i32
    %c0_i32_0 = arith.constant 0 : i32
    return %c0_i32, %arg0 : i32, i32
  }
}

</mosaic_0001>

<bundles_post_ra>
// kernel: tpu_custom_call.1
= control target key start
LH: loop header
LB: loop body
LE: loop exit
PB: predicated region body
PF: predicated region fallthrough
CT: control target
= control target key end

     0   :  { %v373_v1 = vmov 3   ;;  %v374_v2 = vmov 1   ;;  %s501_s0 = inlined_call_operand.vmem [shape: f32[4,128], index: 0, kind: input, shape index: {}]   ;;  %s502_s1 = inlined_call_operand.vmem [shape: f32[10,4], index: 1, kind: input, shape index: {}]   ;;  %s503_s2 = inlined_call_operand.vmem [shape: f32[10,1], index: 2, kind: input, shape index: {}]   ;;  %s504_s3 = inlined_call_operand.vmem [shape: f32[2,10], index: 3, kind: input, shape index: {}]   ;;  %s505_s4 = inlined_call_operand.vmem [shape: f32[2,1], index: 4, kind: input, shape index: {}]   ;;  %s506_s5 = inlined_call_operand.hbm [shape: f32[4,128], index: 5, kind: output, shape index: {}]  }
   0x1   :  { %v22_v0 = vld [vmem:[%s502_s1] sm:$0xff]  ;;  %325 = vset.pattern.permute.xlu0 %v373_v1  ;;  %323 = vset.pattern.permute.xlu1 %v374_v2 }
   0x2   :  { %89 = vperm.xlu0 %325, %v22_v0   ;;  %57 = vperm.xlu1 %323, %v22_v0  }
   0x3   :  { %10 = vsyncpa [#allocation3], 0  ;;  %v375_v3 = vmov 0   ;;  %v376_v4 = vmov 2   ;;  %v24_v5 = vld [vmem:[%s503_s2] sm:$0xff]  ;;  %v377_v10 = vmov 5   ;;  %v48_v16 = vlaneseq }
   0x4   :  { %v26_v6 = vld [vmem:[%s504_s3] sm:$0x3]  ;;  %v23_v8 = vld [vmem:[%s502_s1 + $0x8] sm:$0x3]  ;;  %v378_v11 = vmov 8   ;;  %v379_v12 = vmov 9  }
   0x5   :  { %v27_v7 = vld [vmem:[%s505_s4] sm:$0x3]  ;;  %v25_v9 = vld [vmem:[%s503_s2 + $0x8] sm:$0x3]  ;;  %v380_v13 = vmov 4   ;;  %v381_v14 = vmov 6  }
   0x6   :  { %326 = vset.pattern.permute.xlu0 %v375_v3  ;;  %324 = vset.pattern.permute.xlu1 %v376_v4  ;;  %v382_v15 = vmov 7   ;;  %v432_v17 = vshrl.u32 %v48_v16, 7  ;;  %v21_v21 = vld [vmem:[%s501_s0] sm:$0xf]  ;;  %vm293_vm0 = vcmask 1040384   ;;  %s383_s0 = smov [#allocation2]  }
   0x7   :  { %40 = vperm.xlu0 %326, %v22_v0   ;;  %73 = vperm.xlu1 %324, %v22_v0   ;;  %s304_s3 = sshll.u32 %s383_s0, 4  ;;  %vm295_vm1 = vcmask 1041408   ;;  %s305_s3 = int_to_ptr.vmem [resolvable:$true] %s304_s3 }
   0x8   :  { %v435_v18 = vsub.s32 0, %v432_v17  ;;  %v441_v22 = vsub.s32 1, %v432_v17  ;;  %v445_v24 = vsub.s32 2, %v432_v17  ;;  %v449_v28 = vsub.s32 3, %v432_v17  ;;  %s349_s4 = scalar_lea.vmem %s305_s3, 64  ;;  %p354_p1 = scmp.lt.s32.totalorder %s305_s3, %s305_s3 }
   0x9   :  { %v182_v63 = vsub.s32 4, %v432_v17  ;;  %p350_p0 = scmp.ne.s32.totalorder %s305_s3, %s349_s4  ;;  %p355_p2 = scmp.lt.s32.totalorder %s349_s4, %s349_s4 }
   0xa   :  { %v51_v23 = vrot.slane %v21_v21, %v435_v18  ;;  %v67_v27 = vrot.slane %v21_v21, %v441_v22  ;;  %v83_v30 = vrot.slane %v21_v21, %v445_v24  ;;  %v99_v33 = vrot.slane %v21_v21, %v449_v28 }
   0xb   :  { %30 = vperm.xlu0 %326, %v24_v5   ;;  %327 = vset.pattern.permute.xlu1 %v375_v3  ;;  %p356_p3 = por %p355_p2, %p354_p1 }
   0xc   :  { %113 = vperm.xlu1 %327, %v26_v6  }
   0xd   :  { %p357_p4 = pnand %p356_p3, %p350_p0 }
   0xf   :  { %108 = vperm.xlu0 %326, %v27_v7  }
  0x10   :  { %45 = vperm.xlu1 %327, %v23_v8  }
  0x13   :  { %330 = vset.pattern.permute.xlu0 %v374_v2 }
  0x14   :  { %61 = vperm.xlu0 %330, %v23_v8   ;;  %328 = vset.pattern.permute.xlu1 %v374_v2 }
  0x15   :  { %129 = vperm.xlu1 %328, %v26_v6  }
  0x18   :  { %332 = vset.pattern.permute.xlu0 %v373_v1 }
  0x19   :  { %161 = vperm.xlu0 %332, %v26_v6   ;;  %329 = vset.pattern.permute.xlu1 %v375_v3 }
  0x1a   :  { %35 = vperm.xlu1 %329, %v25_v9  }
  0x1d   :  { %335 = vset.pattern.permute.xlu0 %v377_v10 }
  0x1e   :  { %193 = vperm.xlu0 %335, %v26_v6   ;;  %331 = vset.pattern.permute.xlu1 %v376_v4 }
  0x1f   :  { %145 = vperm.xlu1 %331, %v26_v6  }
  0x22   :  { %338 = vset.pattern.permute.xlu0 %v378_v11 }
  0x23   :  { %77 = vperm.xlu1 %331, %v23_v8   ;;  %241 = vperm.xlu0 %338, %v26_v6  }
  0x27   :  { %333 = vset.pattern.permute.xlu1 %v373_v1  ;;  %340 = vset.pattern.permute.xlu0 %v379_v12 }
  0x28   :  { %93 = vperm.xlu1 %333, %v23_v8   ;;  %v198_v8 = vsub.s32 5, %v432_v17 }
  0x2c   :  { %334 = vset.pattern.permute.xlu1 %v380_v13 }
  0x2d   :  { %177 = vperm.xlu1 %334, %v26_v6  }
  0x31   :  { %336 = vset.pattern.permute.xlu1 %v381_v14 }
  0x32   :  { %209 = vperm.xlu1 %336, %v26_v6  }
  0x36   :  { %337 = vset.pattern.permute.xlu1 %v382_v15  ;;  %v214_v15 = vsub.s32 6, %v432_v17 }
  0x37   :  { %225 = vperm.xlu1 %337, %v26_v6  }
  0x3b   :  { %339 = vset.pattern.permute.xlu1 %v379_v12 }
  0x3c   :  { %257 = vperm.xlu1 %339, %v26_v6  }
  0x81   :  { %v58_v19 = vpop.permute.xlu1 %57  ;;  %v90_v20 = vpop.permute.xlu0 %89 }
  0x82   :  { %v68_v32 = vmul.f32 %v67_v27, %v58_v19  ;;  %v100_v38 = vmul.f32 %v99_v33, %v90_v20 }
  0x86   :  { %v41_v25 = vpop.permute.xlu0 %40  ;;  %v74_v26 = vpop.permute.xlu1 %73 }
  0x87   :  { %v52_v29 = vmul.f32 %v51_v23, %v41_v25  ;;  %v84_v36 = vmul.f32 %v83_v30, %v74_v26  ;;  %v230_v26 = vsub.s32 7, %v432_v17 }
  0x8a   :  { %v31_v31 = vpop.permute.xlu0 %30 }
  0x8b   :  { %v54_v34 = vadd.f32 %v52_v29, %v31_v31  ;;  %v114_v35 = vpop.permute.xlu1 %113 }
  0x8d   :  { %v70_v37 = vadd.f32 %v68_v32, %v54_v34 }
  0x8e   :  { %v109_v46 = vpop.permute.xlu0 %108 }
  0x8f   :  { %v86_v39 = vadd.f32 %v84_v36, %v70_v37  ;;  %v46_v40 = vpop.permute.xlu1 %45 }
  0x90   :  { %v53_v52 = vmul.f32 %v51_v23, %v46_v40 }
  0x91   :  { %v453_v41 = vadd.f32 %v100_v38, %v86_v39 }
  0x93   :  { %v104_v43 = vmax.f32 %v453_v41, 0.0  ;;  %v62_v50 = vpop.permute.xlu0 %61  ;;  %v141_v40 = vrot.slane %v453_v41, %v441_v22 }
  0x94   :  { %v455_v42 = vpop.permute.xlu1 %129  ;;  %v69_v55 = vmul.f32 %v67_v27, %v62_v50  ;;  %v125_v27 = vrot.slane %v453_v41, %v435_v18 }
  0x95   :  { %v119_v45 = vrot.slane %v104_v43, %v435_v18  ;;  %v135_v49 = vrot.slane %v104_v43, %v441_v22  ;;  %v151_v54 = vrot.slane %v104_v43, %v445_v24  ;;  %v167_v0 = vrot.slane %v104_v43, %v449_v28 }
  0x96   :  { %v183_v6 = vrot.slane %v104_v43, %v182_v63  ;;  %v199_v13 = vrot.slane %v104_v43, %v198_v8  ;;  %v215_v21 = vrot.slane %v104_v43, %v214_v15  ;;  %v126_v36 = vmul.f32 %v125_v27, %v114_v35 }
  0x97   :  { %v120_v48 = vmul.f32 %v119_v45, %v114_v35  ;;  %v136_v56 = vmul.f32 %v135_v49, %v455_v42  ;;  %v157_v49 = vrot.slane %v453_v41, %v445_v24  ;;  %v142_v50 = vmul.f32 %v141_v40, %v455_v42 }
  0x98   :  { %v162_v62 = vpop.permute.xlu0 %161  ;;  %v205_v42 = vrot.slane %v453_v41, %v198_v8 }
  0x99   :  { %v36_v44 = vpop.permute.xlu1 %35  ;;  %v121_v53 = vadd.f32 %v120_v48, %v109_v46  ;;  %v168_v4 = vmul.f32 %v167_v0, %v162_v62  ;;  %v127_v48 = vadd.f32 %v126_v36, %v109_v46  ;;  %v221_v0 = vrot.slane %v453_v41, %v214_v15 }
  0x9a   :  { %v55_v57 = vadd.f32 %v53_v52, %v36_v44 }
  0x9b   :  { %v137_v59 = vadd.f32 %v136_v56, %v121_v53  ;;  %v143_v35 = vadd.f32 %v142_v50, %v127_v48  ;;  %v189_v56 = vrot.slane %v453_v41, %v182_v63 }
  0x9c   :  { %v71_v1 = vadd.f32 %v69_v55, %v55_v57 }
  0x9d   :  { %v194_v12 = vpop.permute.xlu0 %193 }
  0x9e   :  { %v146_v47 = vpop.permute.xlu1 %145  ;;  %v200_v16 = vmul.f32 %v199_v13, %v194_v12 }
  0x9f   :  { %v152_v58 = vmul.f32 %v151_v54, %v146_v47  ;;  %v173_v54 = vrot.slane %v453_v41, %v449_v28  ;;  %v237_v28 = vrot.slane %v453_v41, %v230_v26 }
  0xa1   :  { %v153_v2 = vadd.f32 %v152_v58, %v137_v59  ;;  %v174_v59 = vmul.f32 %v173_v54, %v162_v62 }
  0xa2   :  { %v78_v51 = vpop.permute.xlu1 %77  ;;  %v242_v34 = vpop.permute.xlu0 %241 }
  0xa3   :  { %v85_v60 = vmul.f32 %v83_v30, %v78_v51  ;;  %v169_v10 = vadd.f32 %v168_v4, %v153_v2  ;;  %v231_v30 = vrot.slane %v104_v43, %v230_v26  ;;  %v158_v51 = vmul.f32 %v157_v49, %v146_v47 }
  0xa5   :  { %v87_v5 = vadd.f32 %v85_v60, %v71_v1  ;;  %v159_v55 = vadd.f32 %v158_v51, %v143_v35 }
  0xa7   :  { %v94_v61 = vpop.permute.xlu1 %93  ;;  %v175_v24 = vadd.f32 %v174_v59, %v159_v55 }
  0xa8   :  { %v101_v3 = vmul.f32 %v99_v33, %v94_v61  ;;  %v206_v61 = vmul.f32 %v205_v42, %v194_v12 }
  0xaa   :  { %v465_v9 = vadd.f32 %v101_v3, %v87_v5 }
  0xac   :  { %v178_v7 = vpop.permute.xlu1 %177  ;;  %v105_v19 = vmax.f32 %v465_v9, 0.0  ;;  %v253_v62 = vrot.slane %v465_v9, %v435_v18 }
  0xad   :  { %v184_v11 = vmul.f32 %v183_v6, %v178_v7  ;;  %v190_v46 = vmul.f32 %v189_v56, %v178_v7 }
  0xae   :  { %v247_v29 = vrot.slane %v105_v19, %v435_v18  ;;  %v263_v39 = vrot.slane %v105_v19, %v441_v22  ;;  %v254_v8 = vmul.f32 %v253_v62, %v242_v34 }
  0xaf   :  { %v185_v14 = vadd.f32 %v184_v11, %v169_v10  ;;  %v191_v47 = vadd.f32 %v190_v46, %v175_v24  ;;  %v269_v11 = vrot.slane %v465_v9, %v441_v22 }
  0xb0   :  { %v248_v37 = vmul.f32 %v247_v29, %v242_v34 }
  0xb1   :  { %v210_v20 = vpop.permute.xlu1 %209  ;;  %v201_v23 = vadd.f32 %v200_v16, %v185_v14  ;;  %v207_v1 = vadd.f32 %v206_v61, %v191_v47 }
  0xb2   :  { %v216_v25 = vmul.f32 %v215_v21, %v210_v20  ;;  %v222_v2 = vmul.f32 %v221_v0, %v210_v20 }
  0xb4   :  { %v217_v32 = vadd.f32 %v216_v25, %v201_v23  ;;  %v223_v4 = vadd.f32 %v222_v2, %v207_v1 }
  0xb6   :  { %v226_v31 = vpop.permute.xlu1 %225 }
  0xb7   :  { %v232_v33 = vmul.f32 %v231_v30, %v226_v31  ;;  %v238_v3 = vmul.f32 %v237_v28, %v226_v31 }
  0xb9   :  { %v233_v38 = vadd.f32 %v232_v33, %v217_v32  ;;  %v239_v7 = vadd.f32 %v238_v3, %v223_v4 }
  0xbb   :  { %v258_v44 = vpop.permute.xlu1 %257  ;;  %v249_v17 = vadd.f32 %v248_v37, %v233_v38  ;;  %v255_v12 = vadd.f32 %v254_v8, %v239_v7 }
  0xbc   :  { %v264_v45 = vmul.f32 %v263_v39, %v258_v44  ;;  %v270_v13 = vmul.f32 %v269_v11, %v258_v44 }
  0xbe   :  { %v265_v43 = vadd.f32 %v264_v45, %v249_v17  ;;  %v271_v14 = vadd.f32 %v270_v13, %v255_v12 }
  0xc0   :  { %v273_v52 = vrot.slane %v265_v43, 1  ;;  %v291_v16 = vrot.slane %v271_v14, 6 }
  0xc2   :  { %v275_v53 = vsub.f32 %v265_v43, %v273_v52 }
  0xc4   :  { %v276_v57 = vsub.f32 0.0, %v275_v53  ;;  %v282_v58 = vmul.f32 1.442695, %v275_v53 }
  0xc6   :  { %v277_v60 = vmul.f32 1.442695, %v276_v57  ;;  %341 = vpow2.f32 %v282_v58 }
  0xc8   :  { %343 = vpow2.f32 %v277_v60 }
  0xd0   :  { %v342_v63 = vpop.eup %341 }
  0xd1   :  { %v284_v5 = vadd.f32 1.0, %v342_v63 }
  0xd2   :  { %v344_v6 = vpop.eup %343 }
  0xd3   :  { %v279_v10 = vadd.f32 1.0, %v344_v6  ;;  %345 = vrcp.f32 %v284_v5 }
  0xd5   :  { %347 = vrcp.f32 %v279_v10 }
  0xdd   :  { %v346_v41 = vpop.eup %345 }
  0xde   :  { %v288_v15 = vrot.slane %v346_v41, 7 }
  0xdf   :  { %v348_v18 = vpop.eup %347 }
  0xe0   :  { %v294_v19 = vsel %vm293_vm0, %v348_v18, %v288_v15 }
  0xe1   :  { %v296_v20 = vsel %vm295_vm1, %v294_v19, %v291_v16 }
  0xe2   :  { %297 = vst [vmem:[#allocation2] sm:$0xf] %v296_v20 }
  0xe3   :  { %360 = shalt.err (!%p357_p4)
}
  0xe4   :  { %s361_s7 = scalar_lea.hbm %s506_s5, 64 }
  0xe5   :  { %p362_p5 = scmp.ne.s32.totalorder %s506_s5, %s361_s7  ;;  %p365_p6 = scmp.lt.u32.totalorder %s361_s7, %s506_s5 }
  0xe7   :  { %p367_p7 = pnand %p365_p6, %p362_p5 }
  0xe9   :  { %370 = shalt.err (!%p367_p7)
}
  0xea   :  { %307 = dma.vmem_to_hbm [thread:$0]  %s305_s3, 64, %s506_s5, [#allocation3]  }
  0xeb   :  { %371 = dma.done.wait [#allocation3], 64  }
  0xec   :  { %372 = vsyncadd [#allocation3], 4294967232 }
  0xed   :  { %311 = vsyncpa [#allocation3], 1 }

</bundles_post_ra>
